<compile_context>
chip_gen: v5e
topology: v5e:2x2
jax: 0.10.0
libtpu: 0.0.40
codegen_flags: <defaults>
</compile_context>

<pallas_src>
import math
import functools

import jax
import jax.numpy as jnp
from jax.experimental import pallas as pl
from jax.experimental.pallas import tpu as pltpu


def _dwsep_kernel(x_ref, wd_ref, wp_ref, b_ref, o_ref, xpad_ref, *,
                  bt, seq_len, ksize):
    # x_ref   : (bt, L, H)            input tile, channels-last
    # wd_ref  : (K, H)        f32     depthwise weights (per-tap, per-channel)
    # wp_ref  : (H, H)        bf16    pointwise weights, (H_in, H_out)
    # b_ref   : (1, H)        f32     pointwise bias
    # o_ref   : (bt, L, H)            output tile
    # xpad_ref: (bt, L+2p, H) f32     VMEM scratch with zero halo (in-kernel pad)
    pad = ksize // 2
    H = x_ref.shape[-1]

    # Stage tile into the padded scratch; zero only the halo rows every step.
    xpad_ref[:, :pad, :] = jnp.zeros((bt, pad, H), jnp.float32)
    xpad_ref[:, pad + seq_len:, :] = jnp.zeros((bt, pad, H), jnp.float32)
    xpad_ref[:, pad:pad + seq_len, :] = x_ref[...].astype(jnp.float32)

    # Depthwise convolution on the VPU (f32): out[b,l,c] = sum_k x[b,l+k,c]*w[k,c]
    wd = wd_ref[...].astype(jnp.float32)          # hoisted weight load, (K, H)
    acc = jnp.zeros((bt, seq_len, H), jnp.float32)
    for k in range(ksize):                        # static unroll, K = 7
        acc = acc + xpad_ref[:, k:k + seq_len, :] * wd[k]

    # Pointwise (1x1) conv: one fat (bt*L, H) @ (H, H) matmul on the MXU.
    # bf16 inputs, f32 accumulation.
    lhs = acc.reshape(bt * seq_len, H).astype(jnp.bfloat16)
    point = jnp.dot(lhs, wp_ref[...], preferred_element_type=jnp.float32)
    point = point + b_ref[...].astype(jnp.float32)          # (1, H) broadcast
    point = jnp.maximum(point, 0.0)                          # ReLU

    o_ref[...] = point.reshape(bt, seq_len, H).astype(o_ref.dtype)


def _choose_batch_tile(B, L, H, *, target_rows=1024, tile_budget_bytes=2 << 20):
    """How many batch elements to pack per grid step."""
    per_elem_bytes = L * H * 4
    cap = max(1, min(target_rows // max(L, 1),
                     tile_budget_bytes // max(per_elem_bytes, 1)))
    if B >= 2:
        cap = min(cap, B // 2)     # keep grid extent >= 2 (feed both v7x TCs)
    cap = max(1, min(cap, B))
    for bt in range(cap, 0, -1):   # largest divisor of B not exceeding cap
        if B % bt == 0:
            return bt
    return 1


def depthwise_separable_conv1d(x, w_depth, w_point, b_point, *, kernel_size=7):
    """x: (B, L, H); w_depth: (H, 1, K); w_point: (H_out, H_in, 1); b_point: (H,)."""
    B, L, H = x.shape
    K = kernel_size
    pad = K // 2

    bt = _choose_batch_tile(B, L, H)
    grid = (B // bt,)

    # Weight plumbing (plain JAX, tiny arrays only -- x itself is NOT copied).
    wd = jnp.transpose(w_depth[:, 0, :], (1, 0)).astype(jnp.float32)      # (K, H)
    wp_t = jnp.transpose(w_point[:, :, 0], (1, 0)).astype(jnp.bfloat16)   # (H_in, H_out)
    bias = b_point.reshape(1, H).astype(jnp.float32)                      # (1, H)

    kernel = functools.partial(_dwsep_kernel, bt=bt, seq_len=L, ksize=K)

    flops = 2 * B * L * H * H + 2 * K * B * L * H
    bytes_accessed = (B * L * H * x.dtype.itemsize        # read x
                      + B * L * H * x.dtype.itemsize      # write out
                      + K * H * 4 + H * H * 2 + H * 4)    # weights + bias

    return pl.pallas_call(
        kernel,
        out_shape=jax.ShapeDtypeStruct((B, L, H), x.dtype),
        grid_spec=pltpu.PrefetchScalarGridSpec(
            num_scalar_prefetch=0,
            grid=grid,
            in_specs=[
                pl.BlockSpec((bt, L, H), lambda i: (i, 0, 0)),
                pl.BlockSpec((K, H), lambda i: (0, 0)),
                pl.BlockSpec((H, H), lambda i: (0, 0)),
                pl.BlockSpec((1, H), lambda i: (0, 0)),
            ],
            out_specs=pl.BlockSpec((bt, L, H), lambda i: (i, 0, 0)),
            scratch_shapes=[pltpu.VMEM((bt, L + 2 * pad, H), jnp.float32)],
        ),
        compiler_params=pltpu.CompilerParams(
            dimension_semantics=("parallel",)),
        cost_estimate=pl.CostEstimate(
            flops=flops, transcendentals=0, bytes_accessed=bytes_accessed),
    )(x, wd, wp_t, bias)


def _reference(x, w_depth, w_point, b_point, kernel_size=7):
    """Pure-JAX f32 reference matching torch's Conv1d semantics."""
    xt = jnp.transpose(x, (0, 2, 1)).astype(jnp.float32)     # (B, H, L)
    pad = kernel_size // 2
    depth = jax.lax.conv_general_dilated(
        xt, w_depth.astype(jnp.float32),
        window_strides=(1,), padding=[(pad, pad)],
        dimension_numbers=("NCH", "OIH", "NCH"),
        feature_group_count=x.shape[-1])
    point = jax.lax.conv_general_dilated(
        depth, w_point.astype(jnp.float32),
        window_strides=(1,), padding=[(0, 0)],
        dimension_numbers=("NCH", "OIH", "NCH"))
    point = point + b_point.astype(jnp.float32)[None, :, None]
    return jnp.maximum(jnp.transpose(point, (0, 2, 1)), 0.0)


if __name__ == "__main__":
    B, L, H, K = 2, 16, 32, 7

    key = jax.random.PRNGKey(0)
    kx, kd, kp = jax.random.split(key, 3)

    # Input (B, L, H)
    x = jax.random.normal(kx, (B, L, H), dtype=jnp.float32)

    # Deterministic parameter init mimicking the module's __init__:
    # depth_conv.weight: (H, 1, K), xavier_uniform (fan_in = fan_out = K)
    bound = math.sqrt(6.0 / (K + K))
    w_depth = jax.random.uniform(kd, (H, 1, K), minval=-bound, maxval=bound,
                                 dtype=jnp.float32)
    # point_conv.weight: (H, H, 1), kaiming_normal (fan_in = H, relu gain)
    std = math.sqrt(2.0 / H)
    w_point = std * jax.random.normal(kp, (H, H, 1), dtype=jnp.float32)
    # point_conv.bias: zeros
    b_point = jnp.zeros((H,), dtype=jnp.float32)

    out = depthwise_separable_conv1d(x, w_depth, w_point, b_point, kernel_size=K)
    out = jax.block_until_ready(out)

    ref = _reference(x, w_depth, w_point, b_point, kernel_size=K)
    assert out.shape == (B, L, H)
    # Pointwise matmul feeds bf16 into the MXU (f32 accumulate), so compare
    # against the f32 reference with a correspondingly looser tolerance.
    assert jnp.allclose(out, ref, rtol=5e-2, atol=5e-2), "mismatch vs reference"

    print("KERNEL_OK")
</pallas_src>

<mosaic_0001>
module attributes {stable_mosaic.version = 11 : i64} {
  func.func @_dwsep_kernel(%arg0: i32, %arg1: memref<1x16x32xf32, #tpu.memory_space<vmem>>, %arg2: memref<7x32xf32, #tpu.memory_space<vmem>>, %arg3: memref<32x32xbf16, #tpu.memory_space<vmem>>, %arg4: memref<1x32xf32, #tpu.memory_space<vmem>>, %arg5: memref<1x16x32xf32, #tpu.memory_space<vmem>>, %arg6: memref<1x22x32xf32, #tpu.memory_space<vmem>>) attributes {dimension_semantics = [#tpu.dimension_semantics<parallel>], iteration_bounds = array<i64: 2>, scalar_prefetch = 0 : i64, scratch_operands = 1 : i64, tpu.core_type = #tpu.core_type<tc>, window_params = [{transform_indices = @transform_0, window_bounds = array<i64: 1, 16, 32>}, {pipeline_mode = #tpu.pipeline_mode<synchronous>, transform_indices = @transform_1, window_bounds = array<i64: 7, 32>}, {pipeline_mode = #tpu.pipeline_mode<synchronous>, transform_indices = @transform_2, window_bounds = array<i64: 32, 32>}, {pipeline_mode = #tpu.pipeline_mode<synchronous>, transform_indices = @transform_3, window_bounds = array<i64: 1, 32>}, {transform_indices = @transform_4, window_bounds = array<i64: 1, 16, 32>}]} {
    %cst = arith.constant 0.000000e+00 : f32
    %0 = vector.broadcast %cst : f32 to vector<1x3x32xf32>
    %c0 = arith.constant 0 : index
    %c0_0 = arith.constant 0 : index
    %c0_1 = arith.constant 0 : index
    %1 = vector.load %arg6[%c0, %c0_0, %c0_1] : memref<1x22x32xf32, #tpu.memory_space<vmem>>, vector<1x3x32xf32>
    tpu.vector_store %arg6[%c0, %c0_0, %c0_1], %0 {strides = array<i32>} : memref<1x22x32xf32, #tpu.memory_space<vmem>>, vector<1x3x32xf32>,
    %cst_2 = arith.constant 0.000000e+00 : f32
    %2 = vector.broadcast %cst_2 : f32 to vector<1x3x32xf32>
    %c0_3 = arith.constant 0 : index
    %c19 = arith.constant 19 : index
    %c0_4 = arith.constant 0 : index
    %3 = vector.load %arg6[%c0_3, %c19, %c0_4] : memref<1x22x32xf32, #tpu.memory_space<vmem>>, vector<1x3x32xf32>
    tpu.vector_store %arg6[%c0_3, %c19, %c0_4], %2 {strides = array<i32>} : memref<1x22x32xf32, #tpu.memory_space<vmem>>, vector<1x3x32xf32>,
    %c0_5 = arith.constant 0 : index
    %c0_6 = arith.constant 0 : index
    %c0_7 = arith.constant 0 : index
    %4 = vector.load %arg1[%c0_5, %c0_6, %c0_7] : memref<1x16x32xf32, #tpu.memory_space<vmem>>, vector<1x16x32xf32>
    %c0_8 = arith.constant 0 : index
    %c3 = arith.constant 3 : index
    %c0_9 = arith.constant 0 : index
    %5 = vector.load %arg6[%c0_8, %c3, %c0_9] : memref<1x22x32xf32, #tpu.memory_space<vmem>>, vector<1x16x32xf32>
    tpu.vector_store %arg6[%c0_8, %c3, %c0_9], %4 {strides = array<i32>} : memref<1x22x32xf32, #tpu.memory_space<vmem>>, vector<1x16x32xf32>,
    %c0_10 = arith.constant 0 : index
    %c0_11 = arith.constant 0 : index
    %6 = vector.load %arg2[%c0_10, %c0_11] : memref<7x32xf32, #tpu.memory_space<vmem>>, vector<7x32xf32>
    %cst_12 = arith.constant 0.000000e+00 : f32
    %7 = vector.broadcast %cst_12 : f32 to vector<1x16x32xf32>
    %c0_13 = arith.constant 0 : index
    %c0_14 = arith.constant 0 : index
    %c0_15 = arith.constant 0 : index
    %8 = vector.load %arg6[%c0_13, %c0_14, %c0_15] : memref<1x22x32xf32, #tpu.memory_space<vmem>>, vector<1x16x32xf32>
    %9 = vector.extract_strided_slice %6 {offsets = [0, 0], sizes = [1, 32], strides = [1, 1]} : vector<7x32xf32> to vector<1x32xf32>
    %10 = vector.shape_cast %9 : vector<1x32xf32> to vector<32xf32>
    %11 = vector.shape_cast %10 : vector<32xf32> to vector<1x1x32xf32>
    %12 = vector.broadcast %11 : vector<1x1x32xf32> to vector<1x16x32xf32>
    %13 = arith.mulf %8, %12 : vector<1x16x32xf32>
    %14 = arith.addf %7, %13 : vector<1x16x32xf32>
    %c0_16 = arith.constant 0 : index
    %c1 = arith.constant 1 : index
    %c0_17 = arith.constant 0 : index
    %15 = vector.load %arg6[%c0_16, %c1, %c0_17] : memref<1x22x32xf32, #tpu.memory_space<vmem>>, vector<1x16x32xf32>
    %16 = vector.extract_strided_slice %6 {offsets = [1, 0], sizes = [1, 32], strides = [1, 1]} : vector<7x32xf32> to vector<1x32xf32>
    %17 = vector.shape_cast %16 : vector<1x32xf32> to vector<32xf32>
    %18 = vector.shape_cast %17 : vector<32xf32> to vector<1x1x32xf32>
    %19 = vector.broadcast %18 : vector<1x1x32xf32> to vector<1x16x32xf32>
    %20 = arith.mulf %15, %19 : vector<1x16x32xf32>
    %21 = arith.addf %14, %20 : vector<1x16x32xf32>
    %c0_18 = arith.constant 0 : index
    %c2 = arith.constant 2 : index
    %c0_19 = arith.constant 0 : index
    %22 = vector.load %arg6[%c0_18, %c2, %c0_19] : memref<1x22x32xf32, #tpu.memory_space<vmem>>, vector<1x16x32xf32>
    %23 = vector.extract_strided_slice %6 {offsets = [2, 0], sizes = [1, 32], strides = [1, 1]} : vector<7x32xf32> to vector<1x32xf32>
    %24 = vector.shape_cast %23 : vector<1x32xf32> to vector<32xf32>
    %25 = vector.shape_cast %24 : vector<32xf32> to vector<1x1x32xf32>
    %26 = vector.broadcast %25 : vector<1x1x32xf32> to vector<1x16x32xf32>
    %27 = arith.mulf %22, %26 : vector<1x16x32xf32>
    %28 = arith.addf %21, %27 : vector<1x16x32xf32>
    %c0_20 = arith.constant 0 : index
    %c3_21 = arith.constant 3 : index
    %c0_22 = arith.constant 0 : index
    %29 = vector.load %arg6[%c0_20, %c3_21, %c0_22] : memref<1x22x32xf32, #tpu.memory_space<vmem>>, vector<1x16x32xf32>
    %30 = vector.extract_strided_slice %6 {offsets = [3, 0], sizes = [1, 32], strides = [1, 1]} : vector<7x32xf32> to vector<1x32xf32>
    %31 = vector.shape_cast %30 : vector<1x32xf32> to vector<32xf32>
    %32 = vector.shape_cast %31 : vector<32xf32> to vector<1x1x32xf32>
    %33 = vector.broadcast %32 : vector<1x1x32xf32> to vector<1x16x32xf32>
    %34 = arith.mulf %29, %33 : vector<1x16x32xf32>
    %35 = arith.addf %28, %34 : vector<1x16x32xf32>
    %c0_23 = arith.constant 0 : index
    %c4 = arith.constant 4 : index
    %c0_24 = arith.constant 0 : index
    %36 = vector.load %arg6[%c0_23, %c4, %c0_24] : memref<1x22x32xf32, #tpu.memory_space<vmem>>, vector<1x16x32xf32>
    %37 = vector.extract_strided_slice %6 {offsets = [4, 0], sizes = [1, 32], strides = [1, 1]} : vector<7x32xf32> to vector<1x32xf32>
    %38 = vector.shape_cast %37 : vector<1x32xf32> to vector<32xf32>
    %39 = vector.shape_cast %38 : vector<32xf32> to vector<1x1x32xf32>
    %40 = vector.broadcast %39 : vector<1x1x32xf32> to vector<1x16x32xf32>
    %41 = arith.mulf %36, %40 : vector<1x16x32xf32>
    %42 = arith.addf %35, %41 : vector<1x16x32xf32>
    %c0_25 = arith.constant 0 : index
    %c5 = arith.constant 5 : index
    %c0_26 = arith.constant 0 : index
    %43 = vector.load %arg6[%c0_25, %c5, %c0_26] : memref<1x22x32xf32, #tpu.memory_space<vmem>>, vector<1x16x32xf32>
    %44 = vector.extract_strided_slice %6 {offsets = [5, 0], sizes = [1, 32], strides = [1, 1]} : vector<7x32xf32> to vector<1x32xf32>
    %45 = vector.shape_cast %44 : vector<1x32xf32> to vector<32xf32>
    %46 = vector.shape_cast %45 : vector<32xf32> to vector<1x1x32xf32>
    %47 = vector.broadcast %46 : vector<1x1x32xf32> to vector<1x16x32xf32>
    %48 = arith.mulf %43, %47 : vector<1x16x32xf32>
    %49 = arith.addf %42, %48 : vector<1x16x32xf32>
    %c0_27 = arith.constant 0 : index
    %c6 = arith.constant 6 : index
    %c0_28 = arith.constant 0 : index
    %50 = vector.load %arg6[%c0_27, %c6, %c0_28] : memref<1x22x32xf32, #tpu.memory_space<vmem>>, vector<1x16x32xf32>
    %51 = vector.extract_strided_slice %6 {offsets = [6, 0], sizes = [1, 32], strides = [1, 1]} : vector<7x32xf32> to vector<1x32xf32>
    %52 = vector.shape_cast %51 : vector<1x32xf32> to vector<32xf32>
    %53 = vector.shape_cast %52 : vector<32xf32> to vector<1x1x32xf32>
    %54 = vector.broadcast %53 : vector<1x1x32xf32> to vector<1x16x32xf32>
    %55 = arith.mulf %50, %54 : vector<1x16x32xf32>
    %56 = arith.addf %49, %55 : vector<1x16x32xf32>
    %57 = vector.shape_cast %56 : vector<1x16x32xf32> to vector<16x32xf32>
    %58 = arith.truncf %57 : vector<16x32xf32> to vector<16x32xbf16>
    %c0_29 = arith.constant 0 : index
    %c0_30 = arith.constant 0 : index
    %59 = vector.load %arg3[%c0_29, %c0_30] : memref<32x32xbf16, #tpu.memory_space<vmem>>, vector<32x32xbf16>
    %cst_31 = arith.constant dense<0.000000e+00> : vector<16x32xf32>
    %60 = tpu.matmul %58, %59, %cst_31 {dimension_numbers = #tpu.dot_dimension_numbers<[1], [0], [0], [1], [0, 0, 1, 1], [], []>} : vector<16x32xbf16>, vector<32x32xbf16>, vector<16x32xf32> -> vector<16x32xf32>
    %c0_32 = arith.constant 0 : index
    %c0_33 = arith.constant 0 : index
    %61 = vector.load %arg4[%c0_32, %c0_33] : memref<1x32xf32, #tpu.memory_space<vmem>>, vector<1x32xf32>
    %62 = vector.broadcast %61 : vector<1x32xf32> to vector<16x32xf32>
    %63 = arith.addf %60, %62 : vector<16x32xf32>
    %cst_34 = arith.constant 0.000000e+00 : f32
    %64 = vector.broadcast %cst_34 : f32 to vector<16x32xf32>
    %65 = arith.maximumf %63, %64 : vector<16x32xf32>
    %66 = vector.shape_cast %65 : vector<16x32xf32> to vector<1x16x32xf32>
    %c0_35 = arith.constant 0 : index
    %c0_36 = arith.constant 0 : index
    %c0_37 = arith.constant 0 : index
    %67 = vector.load %arg5[%c0_35, %c0_36, %c0_37] : memref<1x16x32xf32, #tpu.memory_space<vmem>>, vector<1x16x32xf32>
    tpu.vector_store %arg5[%c0_35, %c0_36, %c0_37], %66 {strides = array<i32>} : memref<1x16x32xf32, #tpu.memory_space<vmem>>, vector<1x16x32xf32>,
    return
  }
  func.func @transform_0(%arg0: i32) -> (i32, i32, i32) {
    %c0_i32 = arith.constant 0 : i32
    %c0_i32_0 = arith.constant 0 : i32
    %c0_i32_1 = arith.constant 0 : i32
    return %arg0, %c0_i32, %c0_i32_0 : i32, i32, i32
  }
  func.func @transform_1(%arg0: i32) -> (i32, i32) {
    %c0_i32 = arith.constant 0 : i32
    %c0_i32_0 = arith.constant 0 : i32
    %c0_i32_1 = arith.constant 0 : i32
    return %c0_i32, %c0_i32_0 : i32, i32
  }
  func.func @transform_2(%arg0: i32) -> (i32, i32) {
    %c0_i32 = arith.constant 0 : i32
    %c0_i32_0 = arith.constant 0 : i32
    %c0_i32_1 = arith.constant 0 : i32
    return %c0_i32, %c0_i32_0 : i32, i32
  }
  func.func @transform_3(%arg0: i32) -> (i32, i32) {
    %c0_i32 = arith.constant 0 : i32
    %c0_i32_0 = arith.constant 0 : i32
    %c0_i32_1 = arith.constant 0 : i32
    return %c0_i32, %c0_i32_0 : i32, i32
  }
  func.func @transform_4(%arg0: i32) -> (i32, i32, i32) {
    %c0_i32 = arith.constant 0 : i32
    %c0_i32_0 = arith.constant 0 : i32
    %c0_i32_1 = arith.constant 0 : i32
    return %arg0, %c0_i32, %c0_i32_0 : i32, i32, i32
  }
}

</mosaic_0001>

<bundles_post_ra>
// kernel: tpu_custom_call.1
= control target key start
LH: loop header
LB: loop body
LE: loop exit
PB: predicated region body
PF: predicated region fallthrough
CT: control target
= control target key end

     0   :  { %s917_s0 = inlined_call_operand.hbm [shape: f32[2,16,32], index: 0, kind: input, shape index: {}]   ;;  %s918_s1 = inlined_call_operand.hbm [shape: f32[7,32], index: 1, kind: input, shape index: {}]   ;;  %s919_s2 = inlined_call_operand.hbm [shape: bf16[32,32], index: 2, kind: input, shape index: {}]   ;;  %s920_s3 = inlined_call_operand.vmem [shape: f32[1,32], index: 3, kind: input, shape index: {}]   ;;  %s921_s4 = inlined_call_operand.hbm [shape: f32[2,16,32], index: 4, kind: output, shape index: {}]  }
   0x1   :  { %922 = sst [smem:[#allocation13_spill]] %s918_s1 }
   0x2   :  { %923 = sst [smem:[#allocation14_spill]] %s919_s2 }
   0x3   :  { %9 = vsyncpa [#allocation4], 0 }
   0x4   :  { %11 = vsyncpa [#allocation4 + $0x1], 0 }
   0x5   :  { %12 = vsyncpa [#allocation7], 0 }
   0x6   :  { %13 = vsyncpa [#allocation5], 0 }
   0x7   :  { %15 = vsyncpa [#allocation5 + $0x1], 0  ;;  %s760_s15 = smov 0   ;;  %s762_s16 = smov 0  }
   0x8   :  { %s764_s17 = smov 0   ;;  %s766_s18 = smov 0  }
   0x9 LB: > { %s781_s19 = sadd.s32 4294967295, %s724_s18   ;;  %s458_s20 = sadd.s32 4294967294, %s724_s18   ;;  %s724_s18 = sphi %s766_s18, %s936_s18   ;;  %s720_s17 = sphi %s764_s17, %s935_s17   ;;  %s716_s16 = sphi %s762_s16, %s934_s16   ;;  %s712_s15 = sphi %s760_s15, %s933_s15  }
   0xa   : > { %s785_s21 = sadd.s32 1, %s724_s18   ;;  %s28_s22 = sadd.s32 1, %s720_s17 }
   0xb   : > { %s25_s23 = ssub.s32 %s724_s18, %s785_s21  ;;  %p35_p0 = scmp.ne.s32.totalorder %s720_s17, %s716_s16 }
   0xc   : > { %p26_p1 = scmp.eq.s32.totalorder %s25_s23, 0  ;;  %p36_p2 = scmp.eq.s32.totalorder %s724_s18, 0 }
   0xd   : > { %p41_p3 = scmp.ne.s32.totalorder %s716_s16, %s712_s15  ;;  %p42_p4 = scmp.eq.s32.totalorder %s781_s19, 0 }
   0xe   : > { %s797_s24 = scalar_select %p26_p1, %s720_s17, %s28_s22  }
   0xf   : > { %p799_p5 = por %p36_p2, %p35_p0  ;;  %p805_p6 = por %p42_p4, %p41_p3 }
  0x10   : > { %p128_p7 = scmp.eq.s32.totalorder %s781_s19, 1  ;;  %p134_p8 = scmp.eq.s32.totalorder %s458_s20, 1 }
  0x11   : > { %p459_p9 = scmp.ge.s32.totalorder %s724_s18, 1  ;;  %p141_p10 = scmp.lt.s32.totalorder %s724_s18, 3 }
  0x12   : > { %p812_p11 = por %p128_p7, %p35_p0  ;;  %p816_p12 = por %p134_p8, %p41_p3 }
  0x13   : > { %p820_p13 = pnand %p459_p9, %p141_p10  ;;  %s929_s1 = sld [smem:[#allocation13_spill]] }
  0x14   : > { %s726_s7 = smov [#allocation6]   ;;  %p518_p3 = scmp.lt.s32.totalorder %s724_s18, 2 }
  0x15   : > { %p501_p1 = pneg %p820_p13  ;;  %s155_s8 = sshll.u32 %s726_s7, 4  ;;  %s156_s8 = int_to_ptr.vmem [resolvable:$true] %s155_s8 }
  0x16   : > { %s930_s2 = sld [smem:[#allocation14_spill]]  ;;  %p838_p7 = pnand %p518_p3, %p799_p5 }
  0x17   : > { %p502_p2 = pnand %p501_p1, %p42_p4  ;;  %s727_s13 = smov [#allocation8]  }
  0x18   : > { %s166_s14 = sshll.u32 %s727_s13, 4  ;;  %s183_s20 = sand.u32 1, %s720_s17   ;;  %s167_s14 = int_to_ptr.vmem [resolvable:$true] %s166_s14 }
  0x19   : > { %s153_s6 = sshll.u32 %s929_s1, 4  ;;  %s728_s22 = smov 64   ;;  %s154_s6 = int_to_ptr.hbm [resolvable:$true] %s153_s6 }
  0x1a   : > { %504 = dma.hbm_to_vmem [thread:$0]  (!%p502_p2), %s154_s6, 128, %s156_s8, [#allocation7]  }
  0x1b   : > { %s729_s23 = smov 4   ;;  %s463_s30 = sshll.u32 %s183_s20, 4 }
  0x1c   : > { %s164_s11 = sshll.u32 %s930_s2, 4  ;;  %s485_s5 = sshll.u32 %s724_s18, 4  ;;  %s165_s11 = int_to_ptr.hbm [resolvable:$true] %s164_s11 }
  0x1d   : > { %507 = dma.hbm_to_vmem [thread:$0]  (!%p502_p2), %s165_s11, 256, %s167_s14, [#allocation7], %s728_s22, %s728_s22, %s729_s23  }
  0x1e   : > { %s192_s10 = scalar_lea.hbm %s917_s0, %s485_s5  ;;  %s187_s6 = scalar_lea.vmem [#allocation3], %s463_s30 }
  0x1f   : > { %s195_s25 = sshll.u32 %s187_s6, 4  ;;  %s193_s8 = sshll.u32 %s192_s10, 4  ;;  %s196_s25 = int_to_ptr.vmem [resolvable:$true] %s195_s25  ;;  %s194_s8 = int_to_ptr.hbm [resolvable:$true] %s193_s8 }
  0x20   : > { %s184_s1 = scalar_lea.sflag [#allocation4], %s183_s20  ;;  %s624_s2 = sshra.s32 %s194_s8, 4  ;;  %s625_s2 = int_to_ptr.hbm [resolvable:$true] %s624_s2 }
  0x21   : > { %s626_s13 = scalar_lea.hbm %s625_s2, 16  ;;  %p628_p8 = pneg %p838_p7 }
  0x22   : > { %p627_p5 = scmp.ne.s32.totalorder %s625_s2, %s626_s13  ;;  %s631_s22 = scalar_lea.hbm %s917_s0, 32 }
  0x23   : > { %p632_p1 = scmp.lt.s32.totalorder %s625_s2, %s917_s0  ;;  %p633_p2 = scmp.lt.s32.totalorder %s631_s22, %s626_s13 }
  0x24   : > { %p629_p9 = pnand %p628_p8, %p627_p5 }
  0x25   : > { %p634_p3 = por %p633_p2, %p632_p1 }
  0x26   : > { %p630_p10 = pneg %p629_p9 }
  0x28   : > { %p635_p0 = pnand %p634_p3, %p630_p10 }
  0x2a   : > { %638 = shalt.err (!%p635_p0)
}
  0x2b   : > { %s730_s20 = smov 128   ;;  %s731_s30 = smov 8  }
  0x2c   : > { %511 = dma.hbm_to_vmem [thread:$0]  (!%p838_p7), %s194_s8, 256, %s196_s25, %s184_s1, %s730_s20, %s730_s20, %s731_s30  }
  0x2d   : > { %207 = sbr.rel (%p820_p13) target bundleno = 225 (0xe1), region = 36  ;;  %s860_s7 = sand.u32 (!%p820_p13), 1, %s716_s16  }
  0x2e   : > { %s467_s2 = sshll.u32 (!%p820_p13), %s860_s7, 4  ;;  %s210_s9 = scalar_lea.sflag (!%p820_p13), [#allocation4], %s860_s7 }
  0x2f   : > { %s213_s10 = scalar_lea.vmem (!%p820_p13), [#allocation3], %s467_s2 }
  0x32   : > { %699 = dma.done.wait (%p805_p6), %s210_s9, 256  }
  0x33   : > { %701 = vsyncadd (%p805_p6), %s210_s9, 4294967040 }
  0x34   : > { %703 = dma.done.wait (%p42_p4), [#allocation7], 384  }
  0x35   : > { %705 = vsyncadd (%p42_p4), [#allocation7], 4294966912  ;;  %vm250_vm0 = vcmask 256000   ;;  %v732_v0 = vmov 0.0   ;;  %vm255_vm1 = vcmask 261120   ;;  %v487_v1 = vld [vmem:[#allocation8 + $0x8] sm:$0xff] }
  0x36   : > { %251 = vst.msk [vmem:[#allocation2] sm:$0x7] %vm250_vm0, %v732_v0  ;;  %v253_v2 = vld [vmem:[%s213_s10] sm:$0xff]  ;;  %v254_v3 = vld [vmem:[%s213_s10 + $0x8] sm:$0xff]  ;;  %338 = vmatpush.bf16.msra.mxu0 %v487_v1  ;;  %s488_s29 = sshll.u32 %s781_s19, 4  ;;  %s248_s8 = scalar_lea.vmem [#allocation9], %s467_s2 }
  0x37   : > { %252 = vst.msk [vmem:[#allocation2 + $0x13] sm:$0x7] %vm250_vm0, %v732_v0  ;;  %v486_v4 = vld [vmem:[#allocation8] sm:$0xff]  ;;  %v258_v5 = vld [vmem:[#allocation6] sm:$0x7f]  ;;  %s362_s25 = scalar_lea.hbm %s921_s4, %s488_s29  ;;  %s363_s13 = sshll.u32 %s248_s8, 4  ;;  %s364_s13 = int_to_ptr.vmem [resolvable:$true] %s363_s13 }
  0x38   : > { %256 = vst.msk [vmem:[#allocation2 + $0x3] sm:$0xff] %vm255_vm1, %v253_v2  ;;  %v261_v6 = vperm.slane %v258_v5, 0  ;;  %v268_v7 = vperm.slane %v258_v5, 1  ;;  %v275_v8 = vperm.slane %v258_v5, 2  ;;  %v282_v9 = vperm.slane %v258_v5, 3  ;;  %s365_s11 = sshll.u32 %s362_s25, 4  ;;  %s366_s11 = int_to_ptr.hbm [resolvable:$true] %s365_s11 }
  0x39   : > { %257 = vst.msk [vmem:[#allocation2 + $0xb] sm:$0xff] %vm255_vm1, %v254_v3  ;;  %v289_v19 = vperm.slane %v258_v5, 4  ;;  %v296_v29 = vperm.slane %v258_v5, 5  ;;  %v303_v36 = vperm.slane %v258_v5, 6  ;;  %v563_v54 = vld [vmem:[%s920_s3] ss:$0 sm:$0xff] }
  0x3a   : > { %339 = vmatpush.bf16.msra.mxu0 %v486_v4  ;;  %s351_s19 = scalar_lea.sflag [#allocation5], %s860_s7  ;;  %s668_s14 = sshra.s32 %s366_s11, 4  ;;  %s669_s14 = int_to_ptr.hbm [resolvable:$true] %s668_s14 }
  0x3b   : > { %s670_s22 = scalar_lea.hbm %s669_s14, 16  ;;  %s674_s20 = scalar_lea.hbm %s921_s4, 32 }
  0x3c   : > { %p671_p4 = scmp.ne.s32.totalorder %s669_s14, %s670_s22  ;;  %p675_p0 = scmp.lt.s32.totalorder %s669_s14, %s921_s4 }
  0x3d   : > { %p676_p7 = scmp.lt.s32.totalorder %s674_s20, %s670_s22 }
  0x3e   : > { %p672_p6 = pnand %p671_p4, %p812_p11 }
  0x3f   : > { %v259_v10 = vld [vmem:[#allocation2] sm:$0xff]  ;;  %p677_p5 = por %p676_p7, %p675_p0 }
  0x40   : > { %v266_v11 = vld [vmem:[#allocation2 + $0x1] sm:$0xff]  ;;  %v262_v14 = vmul.f32 %v261_v6, %v259_v10  ;;  %v267_v15 = vld [vmem:[#allocation2 + $0x9] sm:$0xff]  ;;  %p673_p13 = pneg %p672_p6 }
  0x41   : > { %v273_v12 = vld [vmem:[#allocation2 + $0x2] sm:$0xff]  ;;  %v269_v16 = vmul.f32 %v268_v7, %v266_v11  ;;  %v274_v17 = vld [vmem:[#allocation2 + $0xa] sm:$0xff]  ;;  %v270_v21 = vmul.f32 %v268_v7, %v267_v15 }
  0x42   : > { %v260_v13 = vld [vmem:[#allocation2 + $0x8] sm:$0xff]  ;;  %v276_v18 = vmul.f32 %v275_v8, %v273_v12  ;;  %v277_v22 = vmul.f32 %v275_v8, %v274_v17  ;;  %p678_p8 = pnand %p677_p5, %p673_p13 }
  0x43   : > { %v263_v20 = vmul.f32 %v261_v6, %v260_v13  ;;  %v280_v23 = vld [vmem:[#allocation2 + $0x3] sm:$0xff]  ;;  %v281_v24 = vld [vmem:[#allocation2 + $0xb] sm:$0xff]  ;;  %v271_v26 = vadd.f32 %v269_v16, %v262_v14 }
  0x44   : > { %v287_v25 = vld [vmem:[#allocation2 + $0x4] sm:$0xff]  ;;  %v283_v27 = vmul.f32 %v282_v9, %v280_v23  ;;  %v288_v28 = vld [vmem:[#allocation2 + $0xc] sm:$0xff]  ;;  %v284_v31 = vmul.f32 %v282_v9, %v281_v24 }
  0x45   : > { %v272_v30 = vadd.f32 %v270_v21, %v263_v20  ;;  %v294_v32 = vld [vmem:[#allocation2 + $0x5] sm:$0xff]  ;;  %v278_v33 = vadd.f32 %v276_v18, %v271_v26  ;;  %v290_v34 = vmul.f32 %v289_v19, %v287_v25  ;;  %v295_v35 = vld [vmem:[#allocation2 + $0xd] sm:$0xff]  ;;  %v291_v38 = vmul.f32 %v289_v19, %v288_v28 }
  0x46   : > { %v301_v39 = vld [vmem:[#allocation2 + $0x6] sm:$0xff]  ;;  %v297_v41 = vmul.f32 %v296_v29, %v294_v32  ;;  %v302_v42 = vld [vmem:[#allocation2 + $0xe] sm:$0xff]  ;;  %v298_v44 = vmul.f32 %v296_v29, %v295_v35 }
  0x47   : > { %v279_v37 = vadd.f32 %v277_v22, %v272_v30  ;;  %v285_v40 = vadd.f32 %v283_v27, %v278_v33  ;;  %v304_v46 = vmul.f32 %v303_v36, %v301_v39  ;;  %v305_v48 = vmul.f32 %v303_v36, %v302_v42 }
  0x49   : > { %v286_v43 = vadd.f32 %v284_v31, %v279_v37  ;;  %v292_v45 = vadd.f32 %v290_v34, %v285_v40 }
  0x4b   : > { %v293_v47 = vadd.f32 %v291_v38, %v286_v43  ;;  %v299_v49 = vadd.f32 %v297_v41, %v292_v45 }
  0x4d   : > { %v300_v50 = vadd.f32 %v298_v44, %v293_v47  ;;  %v306_v51 = vadd.f32 %v304_v46, %v299_v49 }
  0x4f   : > { %v307_v52 = vadd.f32 %v305_v48, %v300_v50 }
  0x51   : > { %v308_v53 = vpack.c.bf16 %v307_v52, %v306_v51 }
  0x53   : > { %479 = vmatmul.msk.bf16.vlgmr.msra.gmra.mxu0 %vm255_vm1, %v308_v53 }
  0xd0   : > { %v341_v55 = vpop.f32.mrf.mxu0 }
  0xd1   : > { %v342_v56 = vadd.f32 %v563_v54, %v341_v55 }
  0xd3   : > { %v346_v57 = vmax.f32 %v342_v56, 0.0 }
  0xd5   : > { %348 = vst.msk [vmem:[%s248_s8] sm:$0xff] %vm255_vm1, %v346_v57 }
  0xd8   : > { %v343_v58 = vpop.f32.mrf.mxu0 }
  0xd9   : > { %v344_v59 = vadd.f32 %v563_v54, %v343_v58 }
  0xdb   : > { %v347_v60 = vmax.f32 %v344_v59, 0.0 }
  0xdd   : > { %349 = vst.msk [vmem:[%s248_s8 + $0x8] sm:$0xff] %vm255_vm1, %v347_v60 }
  0xde   : > { %681 = shalt.err (!%p678_p8)
}
  0xdf   : > { %s733_s7 = smov 128   ;;  %s734_s9 = smov 8  }
  0xe0   : > { %499 = dma.vmem_to_hbm [thread:$0]  (%p812_p11), %s364_s13, 256, %s366_s11, %s351_s19, %s733_s7, %s733_s7, %s734_s9  }
  0xe1 PF: > { %s380_s10 = sand.u32 1, %s712_s15   ;;  %p932_p9 = scmp.ge.s32.totalorder %s724_s18, 2 }
  0xe2   : > { %s381_s1 = scalar_lea.sflag [#allocation5], %s380_s10 }
  0xe3   : > { %p513_p10 = pnand %p932_p9, %p816_p12 }
  0xe5   : > { %p514_p1 = pneg %p513_p10 }
  0xe7   : > { %707 = dma.done.wait (%p514_p1), %s381_s1, 256  }
  0xe8   : > { %709 = vsyncadd (%p514_p1), %s381_s1, 4294967040  ;;  %p18_p2 = scmp.ge.s32.totalorder %s785_s21, 4   ;;  %s933_s15 = smov %s716_s16 }
  0xe9   : > { %s934_s16 = smov %s720_s17  ;;  %s935_s17 = smov %s797_s24 }
  0xea   : > { %s936_s18 = smov %s785_s21  ;;  %20 = sbr.rel (!%p18_p2) target bundleno = 9 (0x9), region = 89 }
  0xef   :  { %387 = vsyncpa [#allocation4], 1 }
  0xf0   :  { %389 = vsyncpa [#allocation4 + $0x1], 1 }
  0xf1   :  { %390 = vsyncpa [#allocation7], 1 }
  0xf2   :  { %391 = vsyncpa [#allocation5], 1 }
  0xf3   :  { %393 = vsyncpa [#allocation5 + $0x1], 1 }

</bundles_post_ra>
